<compile_context>
chip_gen: v5e
topology: v5e:2x2
jax: 0.10.0
libtpu: 0.0.40
codegen_flags: <defaults>
</compile_context>

<pallas_src>
import jax
import jax.numpy as jnp
from jax.experimental import pallas as pl
from jax.experimental.pallas import tpu as pltpu


def _swish_kernel(x_ref, o_ref):
    x = x_ref[...].astype(jnp.float32)
    # swish(x) = x * sigmoid(x) = x / (1 + exp(-x)); exp -> EUP, div/mul -> VPU.
    sig = 1.0 / (1.0 + jnp.exp(-x))
    o_ref[...] = (x * sig).astype(o_ref.dtype)


# Target ~2 MiB per block (computed at 4 B/elem so bf16 inputs promoted to f32
# in-kernel still fit comfortably under v5e's 16 MiB scoped-VMEM default).
_MAX_BLOCK_BYTES = 2 * 1024 * 1024
_LANE_CANDIDATES = (8192, 4096, 2048, 1024, 512, 256, 128)
_MIN_GRID_STEPS = 8  # keep the grid shardable across v7x's 2 TensorCores


def _swish_flat_aligned(x_flat):
    """Swish on a 1-D array whose length is a multiple of 128."""
    n = x_flat.shape[0]
    lanes = next(c for c in _LANE_CANDIDATES if n % c == 0)
    rows = n // lanes
    x2d = x_flat.reshape(rows, lanes)

    # Tile sizing: big, lane-dense blocks; second-to-last dim a multiple of 8
    # (or the full rows extent for small inputs).
    max_tile_rows = max(8, ((_MAX_BLOCK_BYTES // (lanes * 4)) // 8) * 8)
    tile_rows = min(max_tile_rows, rows)
    grid_steps = pl.cdiv(rows, tile_rows)
    if tile_rows < rows and grid_steps < _MIN_GRID_STEPS:
        # Shrink the tile so the grid has enough steps to split across both
        # TensorCores on v7x (neutral on v5e/v6e).
        tile_rows = max(8, (pl.cdiv(rows, _MIN_GRID_STEPS) // 8) * 8)
        grid_steps = pl.cdiv(rows, tile_rows)

    out2d = pl.pallas_call(
        _swish_kernel,
        out_shape=jax.ShapeDtypeStruct((rows, lanes), x_flat.dtype),
        grid_spec=pltpu.PrefetchScalarGridSpec(
            num_scalar_prefetch=0,
            grid=(grid_steps,),
            in_specs=[pl.BlockSpec((tile_rows, lanes), lambda i: (i, 0))],
            out_specs=pl.BlockSpec((tile_rows, lanes), lambda i: (i, 0)),
        ),
        compiler_params=pltpu.CompilerParams(
            dimension_semantics=("parallel",),
        ),
    )(x2d)
    return out2d.reshape(n)


def swish(x):
    """Elementwise swish on an arbitrary-shaped floating array (Pallas TPU)."""
    if not jnp.issubdtype(x.dtype, jnp.floating):
        raise TypeError(f"swish expects a floating dtype, got {x.dtype}")

    orig_shape = x.shape
    x_flat = jnp.ravel(x)
    n = x_flat.shape[0]
    n_bulk = (n // 128) * 128

    if n_bulk == n and n > 0:
        out_flat = _swish_flat_aligned(x_flat)
    elif n_bulk == 0:
        # TODO(synk): arrays smaller than one TPU lane (128 elems) are handled
        # with plain jnp — not worth a kernel launch.
        out_flat = x_flat * jax.nn.sigmoid(x_flat)
    else:
        # Ragged tail: kernel on the 128-aligned bulk, jnp on the (<128) tail.
        bulk_out = _swish_flat_aligned(x_flat[:n_bulk])
        tail = x_flat[n_bulk:]
        out_flat = jnp.concatenate([bulk_out, tail * jax.nn.sigmoid(tail)])

    return out_flat.reshape(orig_shape)


if __name__ == "__main__":
    key = jax.random.PRNGKey(0)
    # NCHW input, consistent with a typical conv-net activation.
    x = jax.random.normal(key, (2, 4, 16, 16), dtype=jnp.float32)

    out = swish(x)
    out = jax.block_until_ready(out)

    # Reference check against plain JAX swish (exact sigmoid in the kernel now,
    # so only a few ulps of f32 rounding separate the two).
    ref = x * jax.nn.sigmoid(x)
    assert out.shape == x.shape and out.dtype == x.dtype
    assert jnp.allclose(out, ref, atol=1e-5, rtol=1e-5)

    print("KERNEL_OK")
</pallas_src>

<mosaic_0001>
module attributes {stable_mosaic.version = 11 : i64} {
  func.func @_swish_kernel(%arg0: i32, %arg1: memref<1x2048xf32, #tpu.memory_space<vmem>>, %arg2: memref<1x2048xf32, #tpu.memory_space<vmem>>) attributes {dimension_semantics = [#tpu.dimension_semantics<parallel>], iteration_bounds = array<i64: 1>, scalar_prefetch = 0 : i64, scratch_operands = 0 : i64, tpu.core_type = #tpu.core_type<tc>, window_params = [{transform_indices = @transform_0, window_bounds = array<i64: 1, 2048>}, {transform_indices = @transform_1, window_bounds = array<i64: 1, 2048>}]} {
    %c0 = arith.constant 0 : index
    %c0_0 = arith.constant 0 : index
    %0 = vector.load %arg1[%c0, %c0_0] : memref<1x2048xf32, #tpu.memory_space<vmem>>, vector<1x2048xf32>
    %cst = arith.constant 0.000000e+00 : f32
    %1 = vector.broadcast %cst : f32 to vector<1x2048xf32>
    %2 = arith.subf %1, %0 : vector<1x2048xf32>
    %3 = math.exp %2 : vector<1x2048xf32>
    %cst_1 = arith.constant 1.000000e+00 : f32
    %4 = vector.broadcast %cst_1 : f32 to vector<1x2048xf32>
    %5 = arith.addf %4, %3 : vector<1x2048xf32>
    %cst_2 = arith.constant 1.000000e+00 : f32
    %6 = vector.broadcast %cst_2 : f32 to vector<1x2048xf32>
    %7 = arith.divf %6, %5 : vector<1x2048xf32>
    %8 = arith.mulf %0, %7 : vector<1x2048xf32>
    %c0_3 = arith.constant 0 : index
    %c0_4 = arith.constant 0 : index
    %9 = vector.load %arg2[%c0_3, %c0_4] : memref<1x2048xf32, #tpu.memory_space<vmem>>, vector<1x2048xf32>
    tpu.vector_store %arg2[%c0_3, %c0_4], %8 {strides = array<i32>} : memref<1x2048xf32, #tpu.memory_space<vmem>>, vector<1x2048xf32>,
    return
  }
  func.func @transform_0(%arg0: i32) -> (i32, i32) {
    %c0_i32 = arith.constant 0 : i32
    %c0_i32_0 = arith.constant 0 : i32
    return %arg0, %c0_i32 : i32, i32
  }
  func.func @transform_1(%arg0: i32) -> (i32, i32) {
    %c0_i32 = arith.constant 0 : i32
    %c0_i32_0 = arith.constant 0 : i32
    return %arg0, %c0_i32 : i32, i32
  }
}

</mosaic_0001>

<bundles_post_ra>
// kernel: tpu_custom_call.1
= control target key start
LH: loop header
LB: loop body
LE: loop exit
PB: predicated region body
PF: predicated region fallthrough
CT: control target
= control target key end

     0   :  { %6 = vsyncpa [#allocation3], 0  ;;  %s164_s0 = inlined_call_operand.hbm [shape: f32[1,2048], index: 0, kind: input, shape index: {}]   ;;  %s165_s1 = inlined_call_operand.hbm [shape: f32[1,2048], index: 1, kind: output, shape index: {}]  }
   0x1   :  { %7 = vsyncpa [#allocation4], 0  ;;  %s13_s8 = sshll.u32 %s164_s0, 4  ;;  %s146_s9 = smov [#allocation2]   ;;  %s14_s8 = int_to_ptr.hbm [resolvable:$true] %s13_s8 }
   0x2   :  { %s15_s10 = sshll.u32 %s146_s9, 4  ;;  %s16_s10 = int_to_ptr.vmem [resolvable:$true] %s15_s10 }
   0x3   :  { %18 = dma.hbm_to_vmem [thread:$0]  %s14_s8, 256, %s16_s10, [#allocation3]  }
   0x4   :  { %142 = dma.done.wait [#allocation3], 256  }
   0x5   :  { %143 = vsyncadd [#allocation3], 4294967040  ;;  %v23_v0 = vld [vmem:[#allocation2] sm:$0xff]  ;;  %v24_v1 = vld [vmem:[#allocation2 + $0x8] sm:$0xff]  ;;  %s147_s0 = smov [#allocation5]   ;;  %s74_s14 = sshll.u32 %s165_s1, 4  ;;  %s75_s14 = int_to_ptr.hbm [resolvable:$true] %s74_s14 }
   0x6   :  { %v25_v2 = vsub.f32 0.0, %v23_v0  ;;  %v26_v3 = vsub.f32 0.0, %v24_v1  ;;  %s72_s11 = sshll.u32 %s147_s0, 4  ;;  %s73_s11 = int_to_ptr.vmem [resolvable:$true] %s72_s11 }
   0x8   :  { %v27_v4 = vmul.f32 1.442695, %v25_v2  ;;  %v29_v5 = vmul.f32 1.442695, %v26_v3 }
   0xa   :  { %86 = vpow2.f32 %v27_v4 }
   0xb   :  { %88 = vpow2.f32 %v29_v5 }
  0x10   :  { %v87_v6 = vpop.eup %86 }
  0x11   :  { %v89_v7 = vpop.eup %88  ;;  %v31_v8 = vadd.f32 1.0, %v87_v6 }
  0x12   :  { %v32_v9 = vadd.f32 1.0, %v89_v7 }
  0x13   :  { %90 = vrcp.f32 %v31_v8  ;;  %vm38_vm0 = vweird.f32 %v31_v8  ;;  %v44_v13 = vand.u32 2147483648, %v31_v8  ;;  %v42_v16 = vand.u32 2147483647, %v31_v8 }
  0x14   :  { %92 = vrcp.f32 %v32_v9  ;;  %v59_v17 = vand.u32 2147483648, %v32_v9  ;;  %vm53_vm2 = vweird.f32 %v32_v9  ;;  %v57_v19 = vand.u32 2147483647, %v32_v9 }
  0x15   :  { %v45_v21 = vor.u32 1.1754944e-38, %v44_v13  ;;  %vm43_vm5 = vcmp.eq.f32.partialorder %v42_v16, 8.507059e+37 }
  0x16   :  { %v60_v24 = vor.u32 1.1754944e-38, %v59_v17  ;;  %vm58_vm7 = vcmp.eq.f32.partialorder %v57_v19, 8.507059e+37 }
  0x19   :  { %v91_v10 = vpop.eup %90 }
  0x1a   :  { %v93_v11 = vpop.eup %92  ;;  %v34_v12 = vmul.f32 %v91_v10, %v31_v8  ;;  %vm39_vm1 = vweird.f32 %v91_v10 }
  0x1b   :  { %v49_v14 = vmul.f32 %v93_v11, %v32_v9  ;;  %vm54_vm3 = vweird.f32 %v93_v11  ;;  %vm40_vm4 = vmor %vm38_vm0, %vm39_vm1 }
  0x1c   :  { %v35_v15 = vsub.f32 1.0, %v34_v12  ;;  %vm55_vm6 = vmor %vm53_vm2, %vm54_vm3 }
  0x1d   :  { %v50_v18 = vsub.f32 1.0, %v49_v14 }
  0x1e   :  { %v36_v20 = vmul.f32 %v91_v10, %v35_v15 }
  0x1f   :  { %v51_v22 = vmul.f32 %v93_v11, %v50_v18 }
  0x20   :  { %v37_v23 = vadd.f32 %v91_v10, %v36_v20 }
  0x21   :  { %v52_v25 = vadd.f32 %v93_v11, %v51_v22 }
  0x22   :  { %v41_v26 = vsel %vm40_vm4, %v91_v10, %v37_v23 }
  0x23   :  { %v46_v27 = vsel %vm43_vm5, %v45_v21, %v41_v26  ;;  %v56_v28 = vsel %vm55_vm6, %v93_v11, %v52_v25 }
  0x24   :  { %v63_v29 = vmul.f32 %v46_v27, %v23_v0  ;;  %v61_v30 = vsel %vm58_vm7, %v60_v24, %v56_v28 }
  0x25   :  { %v64_v31 = vmul.f32 %v61_v30, %v24_v1 }
  0x26   :  { %65 = vst [vmem:[#allocation5] sm:$0xff] %v63_v29 }
  0x27   :  { %66 = vst [vmem:[#allocation5 + $0x8] sm:$0xff] %v64_v31 }
  0x28   :  { %77 = dma.vmem_to_hbm [thread:$0]  %s73_s11, 256, %s75_s14, [#allocation4]  }
  0x29   :  { %144 = dma.done.wait [#allocation4], 256  }
  0x2a   :  { %145 = vsyncadd [#allocation4], 4294967040 }
  0x2b   :  { %82 = vsyncpa [#allocation3], 1 }
  0x2c   :  { %83 = vsyncpa [#allocation4], 1 }

</bundles_post_ra>
